<compile_context>
chip_gen: v7x
topology: tpu7x:2x2x1
jax: 0.10.0
libtpu: 0.0.40
codegen_flags: <defaults>
</compile_context>

<pallas_src>
import functools

import jax
import jax.numpy as jnp
from jax.experimental import pallas as pl
from jax.experimental.pallas import tpu as pltpu

NEG_INF = -1e30  # finite stand-in for -inf (reference only)


# ----------------------------- kernel bodies ---------------------------------
def _pass1_kernel(rc_ref, u_ref, v_ref, vmax_ref, gsum_ref, expv_ref, *,
                  alpha, use_new_softmax, num_nodes, onehot_dtype):
    """Pass 1: per-edge exp numerators + per-destination exp-sum partials.

    rc_ref   : (2, T) int32    packed [row; col]; padded edges carry sentinel N
    u_ref    : (H, N) f32      aa[:, :F] @ x.T
    v_ref    : (H, N) f32      aa[:, F:] @ x.T
    vmax_ref : (H, 1) f32      per-head max over nodes of v
    gsum_ref : (1, GH, N) f32  per-grid-split accumulator (resident over t)
    expv_ref : (GH, T) f32     per-edge exp numerators (reused by pass 2)
    """
    @pl.when(pl.program_id(1) == 0)
    def _():
        gsum_ref[...] = jnp.zeros_like(gsum_ref)

    rc = rc_ref[...]
    row = rc[0:1, :]                                       # (1, T)
    col = rc[1:2, :]
    tile = rc.shape[1]

    node_ids = jax.lax.broadcasted_iota(jnp.int32, (num_nodes, tile), 0)
    oh_row = (node_ids == row).astype(onehot_dtype)        # (N, T), exact 0/1
    oh_col = (node_ids == col).astype(onehot_dtype)

    # Gather u[:, row], v[:, col] via MXU matmuls (MXU has ample slack).
    ug = jnp.dot(u_ref[...], oh_row.astype(jnp.float32),
                 preferred_element_type=jnp.float32)       # (H, T)
    vg = jnp.dot(v_ref[...], oh_col.astype(jnp.float32),
                 preferred_element_type=jnp.float32)       # (H, T)

    e = ug + vg
    e = jnp.where(e > 0, e, alpha * e)                     # LeakyReLU
    # Per-destination shift (constant within each softmax group = row, and an
    # upper bound on e for real edges -> exp argument <= 0, no overflow).
    s = ug + vmax_ref[...]
    s = jnp.where(s > 0, s, alpha * s)
    p = jnp.exp(e - s)                                     # (H, T)

    if use_new_softmax:
        expv = jnp.concatenate(
            [jnp.where(row < col, p, 0.0),                 # flow_out half
             jnp.where(row > col, p, 0.0)], axis=0)        # flow_in  half
    else:
        expv = jnp.where(row < num_nodes, p, 0.0)          # mask padded edges

    expv_ref[...] = expv
    # Segment-sum over the edge (lane) axis: (GH, T) x (N, T)^T -> (GH, N).
    seg = jax.lax.dot_general(expv, oh_row.astype(jnp.float32),
                              (((1,), (1,)), ((), ())),
                              preferred_element_type=jnp.float32)
    gsum_ref[...] += seg[None]


def _pass2_kernel(rc_ref, expv_ref, r_ref, a_ref, *,
                  use_new_softmax, num_nodes, num_heads, onehot_dtype):
    """Pass 2 (slim): gather the precomputed 1/denominator and normalize."""
    row = rc_ref[...][0:1, :]                              # (1, T)
    tile = row.shape[1]
    node_ids = jax.lax.broadcasted_iota(jnp.int32, (num_nodes, tile), 0)
    oh_row = (node_ids == row).astype(onehot_dtype)        # (N, T)
    denom_r = jnp.dot(r_ref[...], oh_row.astype(jnp.float32),
                      preferred_element_type=jnp.float32)  # (GH, T)
    a2 = expv_ref[...] * denom_r
    if use_new_softmax:
        a_ref[...] = a2[:num_heads, :] + a2[num_heads:, :]  # fold out/in halves
    else:
        a_ref[...] = a2


# ------------------------------- wrapper --------------------------------------
def _vmem_capacity_bytes(default=64 * 1024 * 1024):
    try:
        info = pltpu.get_tpu_info()
        return int(getattr(info, "vmem_capacity_bytes", default))
    except Exception:
        return default


def attention_forward(x, row, col, aa, *, alpha, use_new_softmax, eps=1e-12,
                      tile_e=None, onehot_dtype=jnp.float32):
    """AttentionModel.forward: returns a with shape (H, E)."""
    x = x.astype(jnp.float32)
    aa = aa.astype(jnp.float32)
    row = row.astype(jnp.int32)
    col = col.astype(jnp.int32)
    N, F = x.shape
    E = row.shape[0]
    H = aa.shape[0]
    GH = 2 * H if use_new_softmax else H           # stacked (out/in) head rows

    # Tiny (H, N) projections replace the (E, 2F) gather/concat/transpose.
    u = aa[:, :F] @ x.T                             # (H, N)
    v = aa[:, F:] @ x.T                             # (H, N)
    vmax = jnp.max(v, axis=1, keepdims=True)        # (H, 1)

    # ---- tile size derived from the VMEM budget (v7x 64 MiB is binding) ----
    vmem_limit = (_vmem_capacity_bytes() * 3) // 4  # ~48 MiB v7x, ~96 MiB v5e/v6e
    oh_bytes = 2 if onehot_dtype == jnp.bfloat16 else 4
    per_edge = (2 * N * oh_bytes                    # pass-1 oh_row + oh_col
                + 2 * 2 * 4                         # packed row/col, 2x buffered
                + 2 * GH * 4                        # expv out, 2x buffered
                + 2 * GH * 4 + 2 * H * 4)           # pass-2 expv in + a out
    fixed = 4 * (2 * H * N + 3 * GH * N) * 4        # u, v, gsum, r (+headroom)
    tile_cap = max(128, ((vmem_limit // 2 - fixed) // max(per_edge, 1))
                   // 128 * 128)
    if tile_e is None:
        tile_e = 2048                               # amortize ~0.35us/grid-step
    tile_e = max(128, (int(tile_e) // 128) * 128)
    tile = max(128, min(tile_e, tile_cap, pl.cdiv(E, 128) * 128))

    # Pass-1 grid split: leading "parallel" axis -> both v7x TensorCores.
    n_par = 2 if pl.cdiv(E, tile) >= 2 else 1
    n_inner = pl.cdiv(E, tile * n_par)
    n_tiles = n_par * n_inner
    e_pad = n_tiles * tile
    pad = e_pad - E

    # One packed int32 edge stream; sentinel N marks padded edges (they fall
    # outside every one-hot / mask and contribute nothing).
    rowcol = jnp.stack(
        [jnp.concatenate([row, jnp.full((pad,), N, jnp.int32)]),
         jnp.concatenate([col, jnp.full((pad,), N, jnp.int32)])], axis=0)

    # ---- pass 1: numerators + per-destination exp-sum partials ----
    pass1 = functools.partial(_pass1_kernel, alpha=alpha,
                              use_new_softmax=use_new_softmax, num_nodes=N,
                              onehot_dtype=onehot_dtype)
    gsum_parts, expv = pl.pallas_call(
        pass1,
        grid=(n_par, n_inner),
        in_specs=[pl.BlockSpec((2, tile), lambda c, t: (0, c * n_inner + t)),
                  pl.BlockSpec((H, N), lambda c, t: (0, 0)),
                  pl.BlockSpec((H, N), lambda c, t: (0, 0)),
                  pl.BlockSpec((H, 1), lambda c, t: (0, 0))],
        out_specs=[pl.BlockSpec((1, GH, N), lambda c, t: (c, 0, 0)),
                   pl.BlockSpec((GH, tile), lambda c, t: (0, c * n_inner + t))],
        out_shape=(jax.ShapeDtypeStruct((n_par, GH, N), jnp.float32),
                   jax.ShapeDtypeStruct((GH, e_pad), jnp.float32)),
        compiler_params=pltpu.CompilerParams(
            dimension_semantics=("parallel", "arbitrary"),
            vmem_limit_bytes=int(vmem_limit)),
    )(rowcol, u, v, vmax)

    # Hoisted epilogue on tiny (GH, N) tensors: fold splits + one reciprocal.
    gsum = jnp.sum(gsum_parts, axis=0)              # (GH, N)
    r = 1.0 / (gsum + eps)

    # ---- pass 2 (slim): gather 1/denominator, normalize, fold halves ----
    pass2 = functools.partial(_pass2_kernel, use_new_softmax=use_new_softmax,
                              num_nodes=N, num_heads=H,
                              onehot_dtype=onehot_dtype)
    a_pad = pl.pallas_call(
        pass2,
        grid=(n_tiles,),
        in_specs=[pl.BlockSpec((2, tile), lambda t: (0, t)),
                  pl.BlockSpec((GH, tile), lambda t: (0, t)),
                  pl.BlockSpec((GH, N), lambda t: (0, 0))],
        out_specs=pl.BlockSpec((H, tile), lambda t: (0, t)),
        out_shape=jax.ShapeDtypeStruct((H, e_pad), jnp.float32),
        compiler_params=pltpu.CompilerParams(
            dimension_semantics=("parallel",),
            vmem_limit_bytes=int(vmem_limit)),
    )(rowcol, expv, r)

    return a_pad[:, :E]


# ----------------------------- pure-JAX reference -----------------------------
def _ref_scatter_softmax(e, row, member, num_nodes, eps):
    masked = jnp.where(member[None, :], e, NEG_INF)
    seg_max = jax.ops.segment_max(masked.T, row, num_segments=num_nodes)   # (N,H)
    seg_max = jnp.maximum(seg_max, NEG_INF)
    gathered = seg_max[row].T                                              # (H,E)
    expv = jnp.where(member[None, :], jnp.exp(e - gathered), 0.0)
    seg_sum = jax.ops.segment_sum(expv.T, row, num_segments=num_nodes)     # (N,H)
    denom = seg_sum[row].T + eps
    return expv / denom


def reference_forward(x, row, col, aa, *, alpha, use_new_softmax, eps=1e-12):
    N = x.shape[0]
    xx = jnp.concatenate([x[row], x[col]], axis=1)
    e_lin = aa @ xx.T
    e = jnp.where(e_lin > 0, e_lin, alpha * e_lin)
    if use_new_softmax:
        return (_ref_scatter_softmax(e, row, row < col, N, eps)
                + _ref_scatter_softmax(e, row, row > col, N, eps))
    return _ref_scatter_softmax(e, row, jnp.ones_like(row, bool), N, eps)


# ------------------------------------ test ------------------------------------
if __name__ == "__main__":
    alpha = 0.2

    def run_case(key, N, F, H, E, use_new_softmax, tile_e):
        k1, k2, k3, k4 = jax.random.split(key, 4)
        x = jax.random.normal(k1, (N, F), jnp.float32)
        row = jax.random.randint(k2, (E,), 0, N, dtype=jnp.int32)
        col = jax.random.randint(k3, (E,), 0, N, dtype=jnp.int32)
        # xavier_uniform_(aa, gain=1.414): bound = gain * sqrt(6/(fan_in+fan_out))
        fan_in, fan_out = 2 * F, H
        bnd = 1.414 * (6.0 / (fan_in + fan_out)) ** 0.5
        aa = jax.random.uniform(k4, (H, 2 * F), jnp.float32, -bnd, bnd)

        a = attention_forward(x, row, col, aa, alpha=alpha,
                              use_new_softmax=use_new_softmax, tile_e=tile_e)
        a = jax.block_until_ready(a)
        a_ref = reference_forward(x, row, col, aa, alpha=alpha,
                                  use_new_softmax=use_new_softmax)
        assert a.shape == (H, E)
        assert bool(jnp.allclose(a, a_ref, atol=5e-5, rtol=5e-4)), (
            f"mismatch (N={N}, E={E}, new_softmax={use_new_softmax})")

    keys = jax.random.split(jax.random.PRNGKey(0), 4)
    # module-consistent small config
    run_case(keys[0], N=8, F=16, H=4, E=24, use_new_softmax=True, tile_e=None)
    # multi-tile config: exercises the split pass-1 grid + cross-tile accumulator
    run_case(keys[1], N=16, F=16, H=4, E=300, use_new_softmax=True, tile_e=128)
    # old (single) softmax path, single tile
    run_case(keys[2], N=8, F=16, H=4, E=24, use_new_softmax=False, tile_e=None)
    # old softmax path, multi-tile (specialized H-row accumulator)
    run_case(keys[3], N=16, F=16, H=4, E=300, use_new_softmax=False, tile_e=128)
    print("KERNEL_OK")
</pallas_src>

<mosaic_0001>
module attributes {stable_mosaic.version = 11 : i64} {
  func.func @_pass1_kernel(%arg0: i32, %arg1: i32, %arg2: memref<2x128xi32, #tpu.memory_space<vmem>>, %arg3: memref<4x8xf32, #tpu.memory_space<vmem>>, %arg4: memref<4x8xf32, #tpu.memory_space<vmem>>, %arg5: memref<4x1xf32, #tpu.memory_space<vmem>>, %arg6: memref<1x8x8xf32, #tpu.memory_space<vmem>>, %arg7: memref<8x128xf32, #tpu.memory_space<vmem>>) attributes {dimension_semantics = [#tpu.dimension_semantics<parallel>, #tpu.dimension_semantics<arbitrary>], iteration_bounds = array<i64: 1, 1>, scalar_prefetch = 0 : i64, scratch_operands = 0 : i64, tpu.core_type = #tpu.core_type<tc>, window_params = [{transform_indices = @transform_0, window_bounds = array<i64: 2, 128>}, {pipeline_mode = #tpu.pipeline_mode<synchronous>, transform_indices = @transform_1, window_bounds = array<i64: 4, 8>}, {pipeline_mode = #tpu.pipeline_mode<synchronous>, transform_indices = @transform_2, window_bounds = array<i64: 4, 8>}, {pipeline_mode = #tpu.pipeline_mode<synchronous>, transform_indices = @transform_3, window_bounds = array<i64: 4, 1>}, {transform_indices = @transform_4, window_bounds = array<i64: 1, 8, 8>}, {transform_indices = @transform_5, window_bounds = array<i64: 8, 128>}]} {
    %c0_i32 = arith.constant 0 : i32
    %0 = arith.cmpi eq, %arg1, %c0_i32 : i32
    %1 = arith.extui %0 : i1 to i32
    %c0_i32_0 = arith.constant 0 : i32
    %2 = arith.cmpi ne, %1, %c0_i32_0 : i32
    scf.if %2 {
      %cst_24 = arith.constant 0.000000e+00 : f32
      %52 = vector.broadcast %cst_24 : f32 to vector<1x8x8xf32>
      %c0_25 = arith.constant 0 : index
      %c0_26 = arith.constant 0 : index
      %c0_27 = arith.constant 0 : index
      %53 = vector.load %arg6[%c0_25, %c0_26, %c0_27] : memref<1x8x8xf32, #tpu.memory_space<vmem>>, vector<1x8x8xf32>
      tpu.vector_store %arg6[%c0_25, %c0_26, %c0_27], %52 {strides = array<i32>} : memref<1x8x8xf32, #tpu.memory_space<vmem>>, vector<1x8x8xf32>,
    } else {
    }
    %c0 = arith.constant 0 : index
    %c0_1 = arith.constant 0 : index
    %3 = vector.load %arg2[%c0, %c0_1] : memref<2x128xi32, #tpu.memory_space<vmem>>, vector<2x128xi32>
    %4 = vector.extract_strided_slice %3 {offsets = [0, 0], sizes = [1, 128], strides = [1, 1]} : vector<2x128xi32> to vector<1x128xi32>
    %5 = vector.extract_strided_slice %3 {offsets = [1, 0], sizes = [1, 128], strides = [1, 1]} : vector<2x128xi32> to vector<1x128xi32>
    %6 = tpu.iota {dimensions = array<i32: 0>} : vector<8x128xi32>
    %7 = vector.broadcast %4 : vector<1x128xi32> to vector<8x128xi32>
    %8 = arith.cmpi eq, %6, %7 : vector<8x128xi32>
    %9 = arith.extui %8 : vector<8x128xi1> to vector<8x128xi32>
    %10 = arith.sitofp %9 : vector<8x128xi32> to vector<8x128xf32>
    %11 = vector.broadcast %5 : vector<1x128xi32> to vector<8x128xi32>
    %12 = arith.cmpi eq, %6, %11 : vector<8x128xi32>
    %13 = arith.extui %12 : vector<8x128xi1> to vector<8x128xi32>
    %14 = arith.sitofp %13 : vector<8x128xi32> to vector<8x128xf32>
    %c0_2 = arith.constant 0 : index
    %c0_3 = arith.constant 0 : index
    %15 = vector.load %arg3[%c0_2, %c0_3] : memref<4x8xf32, #tpu.memory_space<vmem>>, vector<4x8xf32>
    %cst = arith.constant dense<0.000000e+00> : vector<4x128xf32>
    %16 = tpu.matmul %15, %10, %cst {dimension_numbers = #tpu.dot_dimension_numbers<[1], [0], [0], [1], [0, 0, 1, 1], [], []>} : vector<4x8xf32>, vector<8x128xf32>, vector<4x128xf32> -> vector<4x128xf32>
    %c0_4 = arith.constant 0 : index
    %c0_5 = arith.constant 0 : index
    %17 = vector.load %arg4[%c0_4, %c0_5] : memref<4x8xf32, #tpu.memory_space<vmem>>, vector<4x8xf32>
    %cst_6 = arith.constant dense<0.000000e+00> : vector<4x128xf32>
    %18 = tpu.matmul %17, %14, %cst_6 {dimension_numbers = #tpu.dot_dimension_numbers<[1], [0], [0], [1], [0, 0, 1, 1], [], []>} : vector<4x8xf32>, vector<8x128xf32>, vector<4x128xf32> -> vector<4x128xf32>
    %19 = arith.addf %16, %18 : vector<4x128xf32>
    %cst_7 = arith.constant 0.000000e+00 : f32
    %20 = vector.broadcast %cst_7 : f32 to vector<4x128xf32>
    %21 = arith.cmpf ogt, %19, %20 : vector<4x128xf32>
    %cst_8 = arith.constant 2.000000e-01 : f32
    %22 = vector.broadcast %cst_8 : f32 to vector<4x128xf32>
    %23 = arith.mulf %22, %19 : vector<4x128xf32>
    %24 = arith.select %21, %19, %23 : vector<4x128xi1>, vector<4x128xf32>
    %c0_9 = arith.constant 0 : index
    %c0_10 = arith.constant 0 : index
    %25 = vector.load %arg5[%c0_9, %c0_10] : memref<4x1xf32, #tpu.memory_space<vmem>>, vector<4x1xf32>
    %26 = vector.broadcast %25 : vector<4x1xf32> to vector<4x128xf32>
    %27 = arith.addf %16, %26 : vector<4x128xf32>
    %cst_11 = arith.constant 0.000000e+00 : f32
    %28 = vector.broadcast %cst_11 : f32 to vector<4x128xf32>
    %29 = arith.cmpf ogt, %27, %28 : vector<4x128xf32>
    %cst_12 = arith.constant 2.000000e-01 : f32
    %30 = vector.broadcast %cst_12 : f32 to vector<4x128xf32>
    %31 = arith.mulf %30, %27 : vector<4x128xf32>
    %32 = arith.select %29, %27, %31 : vector<4x128xi1>, vector<4x128xf32>
    %33 = arith.subf %24, %32 : vector<4x128xf32>
    %34 = math.exp %33 : vector<4x128xf32>
    %35 = arith.cmpi slt, %4, %5 : vector<1x128xi32>
    %cst_13 = arith.constant 0.000000e+00 : f32
    %36 = vector.shape_cast %35 : vector<1x128xi1> to vector<1x128xi1>
    %37 = vector.broadcast %36 : vector<1x128xi1> to vector<4x128xi1>
    %38 = vector.broadcast %cst_13 : f32 to vector<4x128xf32>
    %39 = arith.select %37, %34, %38 : vector<4x128xi1>, vector<4x128xf32>
    %40 = arith.cmpi sgt, %4, %5 : vector<1x128xi32>
    %cst_14 = arith.constant 0.000000e+00 : f32
    %41 = vector.shape_cast %40 : vector<1x128xi1> to vector<1x128xi1>
    %42 = vector.broadcast %41 : vector<1x128xi1> to vector<4x128xi1>
    %43 = vector.broadcast %cst_14 : f32 to vector<4x128xf32>
    %44 = arith.select %42, %34, %43 : vector<4x128xi1>, vector<4x128xf32>
    %45 = tpu.concatenate %39, %44 in 0 : vector<4x128xf32>, vector<4x128xf32> -> vector<8x128xf32>
    %c0_15 = arith.constant 0 : index
    %c0_16 = arith.constant 0 : index
    %46 = vector.load %arg7[%c0_15, %c0_16] : memref<8x128xf32, #tpu.memory_space<vmem>>, vector<8x128xf32>
    tpu.vector_store %arg7[%c0_15, %c0_16], %45 {strides = array<i32>} : memref<8x128xf32, #tpu.memory_space<vmem>>, vector<8x128xf32>,
    %cst_17 = arith.constant dense<0.000000e+00> : vector<8x8xf32>
    %47 = tpu.matmul %45, %10, %cst_17 {dimension_numbers = #tpu.dot_dimension_numbers<[1], [1], [0], [0], [0, 0, 1, 0], [], []>} : vector<8x128xf32>, vector<8x128xf32>, vector<8x8xf32> -> vector<8x8xf32>
    %c0_18 = arith.constant 0 : index
    %c0_19 = arith.constant 0 : index
    %c0_20 = arith.constant 0 : index
    %48 = vector.load %arg6[%c0_18, %c0_19, %c0_20] : memref<1x8x8xf32, #tpu.memory_space<vmem>>, vector<1x8x8xf32>
    %49 = vector.shape_cast %47 : vector<8x8xf32> to vector<1x8x8xf32>
    %50 = arith.addf %48, %49 : vector<1x8x8xf32>
    %c0_21 = arith.constant 0 : index
    %c0_22 = arith.constant 0 : index
    %c0_23 = arith.constant 0 : index
    %51 = vector.load %arg6[%c0_21, %c0_22, %c0_23] : memref<1x8x8xf32, #tpu.memory_space<vmem>>, vector<1x8x8xf32>
    tpu.vector_store %arg6[%c0_21, %c0_22, %c0_23], %50 {strides = array<i32>} : memref<1x8x8xf32, #tpu.memory_space<vmem>>, vector<1x8x8xf32>,
    return
  }
  func.func @transform_0(%arg0: i32, %arg1: i32) -> (i32, i32) {
    %c1_i32 = arith.constant 1 : i32
    %0 = arith.muli %arg0, %c1_i32 : i32
    %1 = arith.addi %0, %arg1 : i32
    %c0_i32 = arith.constant 0 : i32
    %c0_i32_0 = arith.constant 0 : i32
    return %c0_i32, %1 : i32, i32
  }
  func.func @transform_1(%arg0: i32, %arg1: i32) -> (i32, i32) {
    %c0_i32 = arith.constant 0 : i32
    %c0_i32_0 = arith.constant 0 : i32
    %c0_i32_1 = arith.constant 0 : i32
    return %c0_i32, %c0_i32_0 : i32, i32
  }
  func.func @transform_2(%arg0: i32, %arg1: i32) -> (i32, i32) {
    %c0_i32 = arith.constant 0 : i32
    %c0_i32_0 = arith.constant 0 : i32
    %c0_i32_1 = arith.constant 0 : i32
    return %c0_i32, %c0_i32_0 : i32, i32
  }
  func.func @transform_3(%arg0: i32, %arg1: i32) -> (i32, i32) {
    %c0_i32 = arith.constant 0 : i32
    %c0_i32_0 = arith.constant 0 : i32
    %c0_i32_1 = arith.constant 0 : i32
    return %c0_i32, %c0_i32_0 : i32, i32
  }
  func.func @transform_4(%arg0: i32, %arg1: i32) -> (i32, i32, i32) {
    %c0_i32 = arith.constant 0 : i32
    %c0_i32_0 = arith.constant 0 : i32
    %c0_i32_1 = arith.constant 0 : i32
    return %arg0, %c0_i32, %c0_i32_0 : i32, i32, i32
  }
  func.func @transform_5(%arg0: i32, %arg1: i32) -> (i32, i32) {
    %c1_i32 = arith.constant 1 : i32
    %0 = arith.muli %arg0, %c1_i32 : i32
    %1 = arith.addi %0, %arg1 : i32
    %c0_i32 = arith.constant 0 : i32
    %c0_i32_0 = arith.constant 0 : i32
    return %c0_i32, %1 : i32, i32
  }
}

</mosaic_0001>

<bundles_post_ra>
// kernel: tpu_custom_call.1
= control target key start
LH: loop header
LB: loop body
LE: loop exit
PB: predicated region body
PF: predicated region fallthrough
CT: control target
= control target key end

     0   :  { %11 = vsyncpa [#allocation3], 0  ;;  %s554_s0 = inlined_call_operand.hbm [shape: s32[2,128], index: 0, kind: input, shape index: {}]   ;;  %s555_s1 = inlined_call_operand.vmem [shape: f32[4,8], index: 1, kind: input, shape index: {}]   ;;  %s556_s2 = inlined_call_operand.vmem [shape: f32[4,8], index: 2, kind: input, shape index: {}]   ;;  %s557_s3 = inlined_call_operand.vmem [shape: f32[4,1], index: 3, kind: input, shape index: {}]   ;;  %s558_s4 = inlined_call_operand.hbm [shape: f32[1,8,8], index: 4, kind: output, shape index: {0}]   ;;  %s559_s5 = inlined_call_operand.hbm [shape: f32[8,128], index: 5, kind: output, shape index: {1}]  }
   0x1   :  { %12 = vsyncpa [#allocation4], 0 }
   0x2   :  { %13 = vsyncpa [#allocation7], 0  ;;  %s465_s18 = smov [#allocation2]   ;;  %s393_s22 = scalar_lea.hbm %s554_s0, 32 }
   0x3   :  { %s23_s19 = sshll.u32 %s465_s18, 4  ;;  %p394_p0 = scmp.ne.s32.totalorder %s554_s0, %s393_s22  ;;  %s24_s19 = int_to_ptr.vmem [resolvable:$true] %s23_s19 }
   0x4   :  { %p397_p1 = scmp.lt.u32.totalorder %s393_s22, %s554_s0 }
   0x6   :  { %p399_p2 = pnand %p397_p1, %p394_p0 }
   0x8   :  { %402 = shalt.err (!%p399_p2)
}
   0x9   :  { %s403_s27 = scalar_lea.vmem %s24_s19, 32  ;;  %p408_p4 = scmp.lt.s32.totalorder %s24_s19, %s24_s19 }
   0xa   :  { %p404_p3 = scmp.ne.s32.totalorder %s24_s19, %s403_s27  ;;  %p409_p5 = scmp.lt.s32.totalorder %s403_s27, %s403_s27 }
   0xc   :  { %p410_p6 = por %p409_p5, %p408_p4 }
   0xe   :  { %p411_p7 = pnand %p410_p6, %p404_p3 }
  0x10   :  { %414 = shalt.err (!%p411_p7)
}
  0x11   :  { %26 = dma.hbm_to_vmem [thread:$0]  %s554_s0, 32, %s24_s19, [#allocation3]  }
  0x12   :  { %459 = dma.done.wait [#allocation3], 32  }
  0x13   :  { %460 = vsyncadd [#allocation3], 4294967264  ;;  %v45_v0 = vlaneseq  ;;  %v466_v1 = vmov 0.0   ;;  %vm42_vm0 = vcmask 64512   ;;  %vm467_vm1 = vmmov 0  }
  0x14   :  { %368 = vmatprep.subr.mxu0 %v466_v1  ;;  %373 = vmatprep.subr.mxu1 %v466_v1  ;;  %43 = vst.msk [vmem:[#allocation5] sm:$0xff] %vm42_vm0, %v466_v1  ;;  %v468_v3 = vmov 0   ;;  %v44_v6 = vld [vmem:[#allocation2] sm:$0x3]  ;;  %v469_v13 = vmov 1.0   ;;  %vm247_vm10 = vcmask 1043456  }
  0x15   :  { %v46_v2 = vshrl.u32 %v45_v0, 7  ;;  %370 = vmatprep.mubr.msk.f32.mxu0 %vm467_vm1, %v466_v1  ;;  %375 = vmatprep.mubr.msk.f32.mxu1 %vm467_vm1, %v466_v1  ;;  %v227_v9 = vrot.slane %v44_v6, 1  ;;  %v214_v10 = vld [vmem:[%s557_s3] sm:$0xf] }
  0x16   :  { %390 = vset.pattern.permute.xlu0 %v468_v3  ;;  %v61_v11 = vld [vmem:[%s555_s1] sm:$0xf]  ;;  %s470_s1 = smov [#allocation6]  }
  0x17   :  { %v49_v4 = vsub.s32 0, %v46_v2  ;;  %v56_v5 = vsub.s32 1, %v46_v2  ;;  %v136_v12 = vld [vmem:[%s556_s2] sm:$0xf]  ;;  %217 = vperm.xlu0 %390, %v214_v10   ;;  %vm228_vm4 = vcmp.lt.s32.totalorder %v44_v6, %v227_v9  ;;  %vm236_vm5 = vcmp.gt.s32.totalorder %v44_v6, %v227_v9  ;;  %s342_s2 = sshll.u32 %s470_s1, 4  ;;  %s343_s2 = int_to_ptr.vmem [resolvable:$true] %s342_s2 }
  0x18   :  { %v229_v14 = vsel %vm228_vm4, 1, %v468_v3  ;;  %v237_v15 = vsel %vm236_vm5, 1, %v468_v3  ;;  %s415_s3 = scalar_lea.vmem %s343_s2, 128  ;;  %p420_p9 = scmp.lt.s32.totalorder %s343_s2, %s343_s2 }
  0x19   :  { %v50_v7 = vrot.slane %v44_v6, %v49_v4  ;;  %v57_v8 = vrot.slane %v44_v6, %v56_v5  ;;  %v233_v16 = vrot.slane %v229_v14, %v49_v4  ;;  %v241_v17 = vrot.slane %v237_v15, %v49_v4  ;;  %p416_p8 = scmp.ne.s32.totalorder %s343_s2, %s415_s3  ;;  %p421_p10 = scmp.lt.s32.totalorder %s415_s3, %s415_s3 }
  0x1b   :  { %vm51_vm2 = vcmp.eq.s32.totalorder %v46_v2, %v50_v7  ;;  %vm58_vm3 = vcmp.eq.s32.totalorder %v46_v2, %v57_v8  ;;  %vm234_vm8 = vcmp.eq.s32.totalorder %v233_v16, 1  ;;  %vm242_vm9 = vcmp.eq.s32.totalorder %v241_v17, 1  ;;  %p422_p11 = por %p421_p10, %p420_p9 }
  0x1c   :  { %369 = vmatpush3.msk.msra.mxu0 %vm51_vm2, %v469_v13  ;;  %374 = vmatpush3.msk.msra.mxu1 %vm58_vm3, %v469_v13 }
  0x1d   :  { %371 = vmatmul.mubr.msk.f32.vlgmr.msra.gmra.mrb[0].mxu0 %vm42_vm0, %v61_v11  ;;  %376 = vmatmul.mubr.msk.f32.vlgmr.msra.gmra.mrb[0].mxu1 %vm42_vm0, %v136_v12  ;;  %p423_p12 = pnand %p422_p11, %p416_p8 }
  0x1e   :  { %378 = vmatprep.subr.mxu0 %v466_v1  ;;  %380 = vmatprep.mubr.msk.f32.mxu0 %vm467_vm1, %v466_v1 }
  0x23   :  { %379 = vmatpush3.xpose.msk.msra.mxu0 %vm51_vm2, %v469_v13 }
  0x96   :  { %v218_v18 = vpop.permute.xlu0 %217 }
  0xf0   :  { %v132_v19 = vpop.f32.mrb[0].mxu0  ;;  %v206_v20 = vpop.f32.mrb[0].mxu1 }
  0xf1   :  { %v220_v21 = vadd.f32 %v218_v18, %v132_v19  ;;  %v210_v22 = vadd.f32 %v206_v20, %v132_v19  ;;  %v372_v23 = vpop.f32.mrb[1].mxu0  ;;  %v377_v24 = vpop.f32.mrb[1].mxu1 }
  0xf3   :  { %vm221_vm6 = vcmp.gt.f32.partialorder %v220_v21, 0.0  ;;  %v222_v25 = vmul.f32 0.2, %v220_v21  ;;  %vm211_vm7 = vcmp.gt.f32.partialorder %v210_v22, 0.0  ;;  %v212_v26 = vmul.f32 0.2, %v210_v22 }
  0xf5   :  { %v223_v27 = vsel %vm221_vm6, %v220_v21, %v222_v25  ;;  %v213_v28 = vsel %vm211_vm7, %v210_v22, %v212_v26 }
  0xf6   :  { %v224_v29 = vsub.f32 %v213_v28, %v223_v27 }
  0xf8   :  { %v225_v30 = vmul.f32 1.442695, %v224_v29 }
  0xfa   :  { %391 = vpow2.f32 %v225_v30 }
 0x104   :  { %v392_v31 = vpop.eup %391 }
 0x105   :  { %v235_v32 = vsel %vm234_vm8, %v392_v31, 0.0  ;;  %v243_v33 = vsel %vm242_vm9, %v392_v31, 0.0 }
 0x106   :  { %v245_v34 = vrot.slane %v243_v33, 4 }
 0x108   :  { %v248_v35 = vsel %vm247_vm10, %v235_v32, %v245_v34 }
 0x109   :  { %381 = vmatmul.mubr.f32.vlgmr.msra.gmra.mrb[2].mxu0 %v248_v35  ;;  %249 = vst [vmem:[#allocation6] sm:$0xff] %v248_v35 }
 0x10a   :  { %426 = shalt.err (!%p423_p12)
}
 0x10b   :  { %s427_s12 = scalar_lea.hbm %s559_s5, 128 }
 0x10c   :  { %p428_p13 = scmp.ne.s32.totalorder %s559_s5, %s427_s12  ;;  %p431_p0 = scmp.lt.u32.totalorder %s427_s12, %s559_s5 }
 0x10e   :  { %p433_p1 = pnand %p431_p0, %p428_p13 }
 0x110   :  { %436 = shalt.err (!%p433_p1)
}
 0x111   :  { %345 = dma.vmem_to_hbm [thread:$0]  %s343_s2, 128, %s559_s5, [#allocation7]   ;;  %v320_v36 = vld [vmem:[#allocation5] sm:$0xff] }
 0x112   :  { %s471_s19 = smov [#allocation5]  }
 0x113   :  { %s329_s20 = sshll.u32 %s471_s19, 4  ;;  %s330_s20 = int_to_ptr.vmem [resolvable:$true] %s329_s20 }
 0x114   :  { %s437_s21 = scalar_lea.vmem %s330_s20, 128  ;;  %p442_p3 = scmp.lt.s32.totalorder %s330_s20, %s330_s20 }
 0x115   :  { %p438_p2 = scmp.ne.s32.totalorder %s330_s20, %s437_s21  ;;  %p443_p4 = scmp.lt.s32.totalorder %s437_s21, %s437_s21 }
 0x117   :  { %p444_p5 = por %p443_p4, %p442_p3 }
 0x119   :  { %p445_p6 = pnand %p444_p5, %p438_p2 }
 0x1dc   :  { %v316_v37 = vpop.f32.mrb[2].mxu0 }
 0x1dd   :  { %v321_v38 = vadd.f32 %v320_v36, %v316_v37  ;;  %v382_v39 = vpop.f32.mrb[3].mxu0 }
 0x1df   :  { %322 = vst.msk [vmem:[#allocation5] sm:$0xff] %vm42_vm0, %v321_v38 }
 0x1e0   :  { %448 = shalt.err (!%p445_p6)
}
 0x1e1   :  { %s449_s5 = scalar_lea.hbm %s558_s4, 128 }
 0x1e2   :  { %p450_p7 = scmp.ne.s32.totalorder %s558_s4, %s449_s5  ;;  %p453_p8 = scmp.lt.u32.totalorder %s449_s5, %s558_s4 }
 0x1e4   :  { %p455_p9 = pnand %p453_p8, %p450_p7 }
 0x1e6   :  { %458 = shalt.err (!%p455_p9)
}
 0x1e7   :  { %332 = dma.vmem_to_hbm [thread:$0]  %s330_s20, 128, %s558_s4, [#allocation4]  }
 0x1e8   :  { %461 = dma.done.wait [#allocation4], 128  }
 0x1e9   :  { %462 = vsyncadd [#allocation4], 4294967168 }
 0x1ea   :  { %463 = dma.done.wait [#allocation7], 128  }
 0x1eb   :  { %464 = vsyncadd [#allocation7], 4294967168 }
 0x1ec   :  { %352 = vsyncpa [#allocation3], 1 }
 0x1ed   :  { %353 = vsyncpa [#allocation4], 1 }
 0x1ee   :  { %354 = vsyncpa [#allocation7], 1 }

</bundles_post_ra>
